<compile_context>
chip_gen: v7x
topology: tpu7x:2x2x1
jax: 0.10.0
libtpu: 0.0.40
codegen_flags: <defaults>
</compile_context>

<pallas_src>
import functools

import jax
import jax.numpy as jnp
from jax.experimental import pallas as pl
from jax.experimental.pallas import tpu as pltpu

HIDDEN = 256
LANE = 128


def dqn_kernel(x_ref, w1_ref, b1_ref, w2_ref, b2_ref, o_ref):
    # x:(TM, N_STATES)  w1:(HIDDEN, N_STATES)  b1:(1, HIDDEN)
    # w2:(N_PAD, HIDDEN) b2:(1, N_PAD)         o:(TM, N_PAD)
    x = x_ref[...]
    # h = x @ w1.T  (contract x axis 1 with w1 axis 1; MXU handles the
    # transposed operand natively, f32 accumulation).
    h = jax.lax.dot_general(
        x, w1_ref[...],
        dimension_numbers=(((1,), (1,)), ((), ())),
        preferred_element_type=jnp.float32)
    h = jnp.maximum(h + b1_ref[...], 0.0)          # bias + ReLU
    # y = h @ w2.T  (lane-padded output width -> lane-dense store)
    y = jax.lax.dot_general(
        h, w2_ref[...],
        dimension_numbers=(((1,), (1,)), ((), ())),
        preferred_element_type=jnp.float32)
    y = y + b2_ref[...]
    o_ref[...] = y.astype(o_ref.dtype)


def _round_up(n, m):
    return ((n + m - 1) // m) * m


@functools.partial(jax.jit, static_argnames=("block_m",))
def dqn_forward(x, w1, b1, w2, b2, *, block_m=512):
    """x: (B, N_STATES) f32; w1: (256, N_STATES); b1: (256,);
    w2: (N_ACTIONS, 256); b2: (N_ACTIONS,). Returns (B, N_ACTIONS)."""
    B, n_states = x.shape
    hidden = w1.shape[0]
    n_actions = w2.shape[0]

    # Lane-pad the output dimension to a multiple of 128 (zero rows in w2 /
    # zero entries in b2 contribute nothing; we slice the result afterwards).
    n_pad = _round_up(max(n_actions, LANE), LANE)
    w2_p = jnp.pad(w2, ((0, n_pad - n_actions), (0, 0)))      # (N_PAD, HIDDEN)
    b2_p = jnp.pad(b2, (0, n_pad - n_actions)).reshape(1, n_pad)
    b1_2d = b1.reshape(1, hidden)

    cost = pl.CostEstimate(
        flops=2 * B * n_states * hidden + 2 * B * hidden * n_pad,
        transcendentals=0,
        bytes_accessed=4 * (B * n_states + hidden * n_states + hidden
                            + n_pad * hidden + n_pad + B * n_pad),
    )

    if _round_up(B, 8) <= block_m:
        # Small batch: single VMEM-resident block, no grid, no pipelining.
        B_pad = _round_up(B, 8)
        x_p = jnp.pad(x, ((0, B_pad - B), (0, 0)))
        vmem = pl.BlockSpec(memory_space=pltpu.MemorySpace.VMEM)
        out = pl.pallas_call(
            dqn_kernel,
            out_shape=jax.ShapeDtypeStruct((B_pad, n_pad), x.dtype),
            in_specs=[vmem] * 5,
            out_specs=vmem,
            cost_estimate=cost,
        )(x_p, w1, b1_2d, w2_p, b2_p)
    else:
        # Large batch: tile the batch axis; weights stay resident across steps.
        B_pad = _round_up(B, block_m)
        x_p = jnp.pad(x, ((0, B_pad - B), (0, 0)))
        num_blocks = B_pad // block_m
        grid_spec = pl.GridSpec(
            grid=(num_blocks,),
            in_specs=[
                pl.BlockSpec((block_m, n_states), lambda i: (i, 0)),
                pl.BlockSpec((hidden, n_states), lambda i: (0, 0)),
                pl.BlockSpec((1, hidden), lambda i: (0, 0)),
                pl.BlockSpec((n_pad, hidden), lambda i: (0, 0)),
                pl.BlockSpec((1, n_pad), lambda i: (0, 0)),
            ],
            out_specs=pl.BlockSpec((block_m, n_pad), lambda i: (i, 0)),
        )
        out = pl.pallas_call(
            dqn_kernel,
            out_shape=jax.ShapeDtypeStruct((B_pad, n_pad), x.dtype),
            grid_spec=grid_spec,
            compiler_params=pltpu.CompilerParams(
                dimension_semantics=("parallel",)),
            cost_estimate=cost,
        )(x_p, w1, b1_2d, w2_p, b2_p)

    return out[:B, :n_actions]


def reference_forward(x, w1, b1, w2, b2):
    h = jnp.maximum(x @ w1.T + b1, 0.0)
    return h @ w2.T + b2


if __name__ == "__main__":
    N_STATES, N_ACTIONS = 16, 4

    key = jax.random.PRNGKey(0)
    kx, kw1, kb1, kw2, kb2, kx2 = jax.random.split(key, 6)

    # weight.data.normal_(0, 0.1) as in the PyTorch __init__
    w1 = 0.1 * jax.random.normal(kw1, (HIDDEN, N_STATES), dtype=jnp.float32)
    w2 = 0.1 * jax.random.normal(kw2, (N_ACTIONS, HIDDEN), dtype=jnp.float32)
    # PyTorch Linear default bias init: U(-1/sqrt(fan_in), 1/sqrt(fan_in))
    b1 = jax.random.uniform(kb1, (HIDDEN,), dtype=jnp.float32,
                            minval=-1.0 / (N_STATES ** 0.5),
                            maxval=1.0 / (N_STATES ** 0.5))
    b2 = jax.random.uniform(kb2, (N_ACTIONS,), dtype=jnp.float32,
                            minval=-1.0 / (HIDDEN ** 0.5),
                            maxval=1.0 / (HIDDEN ** 0.5))

    # --- small batch (gridless, VMEM-resident path) ---
    B_small = 8
    x = jax.random.normal(kx, (B_small, N_STATES), dtype=jnp.float32)
    out = dqn_forward(x, w1, b1, w2, b2)
    jax.block_until_ready(out)
    ref = reference_forward(x, w1, b1, w2, b2)
    assert out.shape == (B_small, N_ACTIONS)
    assert jnp.allclose(out, ref, atol=1e-4, rtol=1e-4), "small-batch mismatch"

    # --- large batch (batch-tiled grid path, parallel on v7x megacore) ---
    B_big = 1024
    x_big = jax.random.normal(kx2, (B_big, N_STATES), dtype=jnp.float32)
    out_big = dqn_forward(x_big, w1, b1, w2, b2, block_m=512)
    jax.block_until_ready(out_big)
    ref_big = reference_forward(x_big, w1, b1, w2, b2)
    assert out_big.shape == (B_big, N_ACTIONS)
    assert jnp.allclose(out_big, ref_big, atol=1e-4, rtol=1e-4), \
        "large-batch mismatch"

    print("KERNEL_OK")
</pallas_src>

<mosaic_0001>
module attributes {stable_mosaic.version = 11 : i64} {
  func.func @dqn_kernel(%arg0: memref<8x16xf32, #tpu.memory_space<vmem>>, %arg1: memref<256x16xf32, #tpu.memory_space<vmem>>, %arg2: memref<1x256xf32, #tpu.memory_space<vmem>>, %arg3: memref<128x256xf32, #tpu.memory_space<vmem>>, %arg4: memref<1x128xf32, #tpu.memory_space<vmem>>, %arg5: memref<8x128xf32, #tpu.memory_space<vmem>>) attributes {dimension_semantics = [], scalar_prefetch = 0 : i64, scratch_operands = 0 : i64, tpu.core_type = #tpu.core_type<tc>} {
    %c0 = arith.constant 0 : index
    %c0_0 = arith.constant 0 : index
    %0 = vector.load %arg0[%c0, %c0_0] : memref<8x16xf32, #tpu.memory_space<vmem>>, vector<8x16xf32>
    %c0_1 = arith.constant 0 : index
    %c0_2 = arith.constant 0 : index
    %1 = vector.load %arg1[%c0_1, %c0_2] : memref<256x16xf32, #tpu.memory_space<vmem>>, vector<256x16xf32>
    %cst = arith.constant dense<0.000000e+00> : vector<8x256xf32>
    %2 = tpu.matmul %0, %1, %cst {dimension_numbers = #tpu.dot_dimension_numbers<[1], [1], [0], [0], [0, 0, 1, 0], [], []>} : vector<8x16xf32>, vector<256x16xf32>, vector<8x256xf32> -> vector<8x256xf32>
    %c0_3 = arith.constant 0 : index
    %c0_4 = arith.constant 0 : index
    %3 = vector.load %arg2[%c0_3, %c0_4] : memref<1x256xf32, #tpu.memory_space<vmem>>, vector<1x256xf32>
    %4 = vector.broadcast %3 : vector<1x256xf32> to vector<8x256xf32>
    %5 = arith.addf %2, %4 : vector<8x256xf32>
    %cst_5 = arith.constant 0.000000e+00 : f32
    %6 = vector.broadcast %cst_5 : f32 to vector<8x256xf32>
    %7 = arith.maximumf %5, %6 : vector<8x256xf32>
    %c0_6 = arith.constant 0 : index
    %c0_7 = arith.constant 0 : index
    %8 = vector.load %arg3[%c0_6, %c0_7] : memref<128x256xf32, #tpu.memory_space<vmem>>, vector<128x256xf32>
    %cst_8 = arith.constant dense<0.000000e+00> : vector<8x128xf32>
    %9 = tpu.matmul %7, %8, %cst_8 {dimension_numbers = #tpu.dot_dimension_numbers<[1], [1], [0], [0], [0, 0, 1, 0], [], []>} : vector<8x256xf32>, vector<128x256xf32>, vector<8x128xf32> -> vector<8x128xf32>
    %c0_9 = arith.constant 0 : index
    %c0_10 = arith.constant 0 : index
    %10 = vector.load %arg4[%c0_9, %c0_10] : memref<1x128xf32, #tpu.memory_space<vmem>>, vector<1x128xf32>
    %11 = vector.broadcast %10 : vector<1x128xf32> to vector<8x128xf32>
    %12 = arith.addf %9, %11 : vector<8x128xf32>
    %c0_11 = arith.constant 0 : index
    %c0_12 = arith.constant 0 : index
    %13 = vector.load %arg5[%c0_11, %c0_12] : memref<8x128xf32, #tpu.memory_space<vmem>>, vector<8x128xf32>
    tpu.vector_store %arg5[%c0_11, %c0_12], %12 {strides = array<i32>} : memref<8x128xf32, #tpu.memory_space<vmem>>, vector<8x128xf32>,
    return
  }
}

</mosaic_0001>

<bundles_post_ra>
// kernel: dqn_forward.1
= control target key start
LH: loop header
LB: loop body
LE: loop exit
PB: predicated region body
PF: predicated region fallthrough
CT: control target
= control target key end

     0   :  { %vm65_vm0 = vcmask 130048   ;;  %s778_s1 = inlined_call_operand.vmem [shape: f32[256,16], index: 1, kind: input, shape index: {}]   ;;  %s779_s0 = inlined_call_operand.vmem [shape: f32[8,16], index: 0, kind: input, shape index: {}]   ;;  %s780_s3 = inlined_call_operand.vmem [shape: f32[128,256], index: 3, kind: input, shape index: {}]   ;;  %s781_s2 = inlined_call_operand.vmem [shape: f32[1,256], index: 2, kind: input, shape index: {}]   ;;  %s782_s4 = inlined_call_operand.vmem [shape: f32[1,128], index: 4, kind: input, shape index: {}]   ;;  %s783_s5 = inlined_call_operand.vmem [shape: f32[8,128], index: 5, kind: output, shape index: {}]  }
   0x1   :  { %v37_v0 = vld [vmem:[%s778_s1 + $0x80] sm:$0xff]  ;;  %v38_v1 = vld [vmem:[%s778_s1 + $0x88] sm:$0xff]  ;;  %vm538_vm1 = vmpackc.low %vm65_vm0, %vm65_vm0 }
   0x2   :  { %v420_v3 = vpack.c.bf16 %v38_v1, %v37_v0  ;;  %v21_v4 = vld [vmem:[%s778_s1] sm:$0xff]  ;;  %v22_v5 = vld [vmem:[%s778_s1 + $0x8] sm:$0xff]  ;;  %v39_v6 = vld [vmem:[%s778_s1 + $0x90] sm:$0xff] }
   0x3   :  { %v423_v7 = vpack.c.bf16 %v22_v5, %v21_v4  ;;  %v40_v8 = vld [vmem:[%s778_s1 + $0x98] sm:$0xff]  ;;  %v23_v10 = vld [vmem:[%s778_s1 + $0x10] sm:$0xff]  ;;  %v41_v12 = vld [vmem:[%s778_s1 + $0xa0] sm:$0xff] }
   0x4   :  { %422 = vmatprep.subr.msk.bf16.mxu0 %vm538_vm1, %v420_v3  ;;  %v426_v9 = vpack.c.bf16 %v40_v8, %v39_v6  ;;  %v24_v11 = vld [vmem:[%s778_s1 + $0x18] sm:$0xff]  ;;  %v42_v13 = vld [vmem:[%s778_s1 + $0xa8] sm:$0xff]  ;;  %v575_v16 = vld [vmem:[%s779_s0] sm:$0xff] }
   0x5   :  { %425 = vmatpush3.bf16.xpose.msk.msra.mxu0 %vm538_vm1, %v423_v7  ;;  %v429_v14 = vpack.c.bf16 %v24_v11, %v23_v10  ;;  %v432_v15 = vpack.c.bf16 %v42_v13, %v41_v12  ;;  %v239_v17 = vld [vmem:[%s780_s3 + $0x8] sm:$0xff]  ;;  %v241_v18 = vld [vmem:[%s780_s3 + $0x18] sm:$0xff]  ;;  %418 = vmatprep.mubr.msk.f32.mxu0 %vm65_vm0, %v575_v16  ;;  %v238_v20 = vld [vmem:[%s780_s3] sm:$0xff] }
   0x6   :  { %428 = vmatprep.subr.msk.bf16.mxu0 %vm538_vm1, %v426_v9  ;;  %v468_v19 = vpack.c.bf16 %v241_v18, %v239_v17  ;;  %v240_v21 = vld [vmem:[%s780_s3 + $0x10] sm:$0xff]  ;;  %v243_v22 = vld [vmem:[%s780_s3 + $0x28] sm:$0xff]  ;;  %v25_v23 = vld [vmem:[%s778_s1 + $0x20] sm:$0xff] }
   0x7   :  { %v26_v24 = vld [vmem:[%s778_s1 + $0x28] sm:$0xff]  ;;  %v470_v25 = vpack.c.bf16 %v240_v21, %v238_v20  ;;  %v245_v26 = vld [vmem:[%s780_s3 + $0x38] sm:$0xff]  ;;  %v43_v27 = vld [vmem:[%s778_s1 + $0xb0] sm:$0xff] }
   0x8   :  { %v44_v28 = vld [vmem:[%s778_s1 + $0xb8] sm:$0xff]  ;;  %469 = vmatprep.subr.bf16.mxu1 %v468_v19  ;;  %v472_v29 = vpack.c.bf16 %v245_v26, %v243_v22  ;;  %v435_v30 = vpack.c.bf16 %v26_v24, %v25_v23  ;;  %v242_v31 = vld [vmem:[%s780_s3 + $0x20] sm:$0xff]  ;;  %v244_v32 = vld [vmem:[%s780_s3 + $0x30] sm:$0xff] }
   0x9   :  { %471 = vmatpush1.bf16.xpose.msra.mxu1 %v470_v25  ;;  %v438_v33 = vpack.c.bf16 %v44_v28, %v43_v27  ;;  %v247_v34 = vld [vmem:[%s780_s3 + $0x48] sm:$0xff]  ;;  %v249_v35 = vld [vmem:[%s780_s3 + $0x58] sm:$0xff]  ;;  %v474_v36 = vpack.c.bf16 %v244_v32, %v242_v31  ;;  %v27_v38 = vld [vmem:[%s778_s1 + $0x30] sm:$0xff] }
   0xa   :  { %473 = vmatprep.subr.bf16.mxu1 %v472_v29  ;;  %v476_v37 = vpack.c.bf16 %v249_v35, %v247_v34  ;;  %v28_v39 = vld [vmem:[%s778_s1 + $0x38] sm:$0xff]  ;;  %v45_v40 = vld [vmem:[%s778_s1 + $0xc0] sm:$0xff]  ;;  %v46_v41 = vld [vmem:[%s778_s1 + $0xc8] sm:$0xff] }
   0xb   :  { %v441_v42 = vpack.c.bf16 %v28_v39, %v27_v38  ;;  %v246_v43 = vld [vmem:[%s780_s3 + $0x40] sm:$0xff]  ;;  %v248_v44 = vld [vmem:[%s780_s3 + $0x50] sm:$0xff]  ;;  %v444_v45 = vpack.c.bf16 %v46_v41, %v45_v40  ;;  %v251_v46 = vld [vmem:[%s780_s3 + $0x68] sm:$0xff] }
   0xc   :  { %v253_v47 = vld [vmem:[%s780_s3 + $0x78] sm:$0xff]  ;;  %v478_v48 = vpack.c.bf16 %v248_v44, %v246_v43  ;;  %v29_v50 = vld [vmem:[%s778_s1 + $0x40] sm:$0xff]  ;;  %v30_v51 = vld [vmem:[%s778_s1 + $0x48] sm:$0xff] }
   0xd   :  { %431 = vmatpush3.bf16.xpose.msk.msra.mxu0 %vm538_vm1, %v429_v14  ;;  %v480_v49 = vpack.c.bf16 %v253_v47, %v251_v46  ;;  %v47_v52 = vld [vmem:[%s778_s1 + $0xd0] sm:$0xff]  ;;  %v48_v53 = vld [vmem:[%s778_s1 + $0xd8] sm:$0xff]  ;;  %v447_v54 = vpack.c.bf16 %v30_v51, %v29_v50  ;;  %v250_v55 = vld [vmem:[%s780_s3 + $0x60] sm:$0xff] }
   0xe   :  { %434 = vmatprep.subr.msk.bf16.mxu0 %vm538_vm1, %v432_v15  ;;  %v252_v56 = vld [vmem:[%s780_s3 + $0x70] sm:$0xff]  ;;  %v450_v57 = vpack.c.bf16 %v48_v53, %v47_v52  ;;  %v255_v58 = vld [vmem:[%s780_s3 + $0x88] sm:$0xff]  ;;  %v257_v59 = vld [vmem:[%s780_s3 + $0x98] sm:$0xff] }
   0xf   :  { %v482_v60 = vpack.c.bf16 %v252_v56, %v250_v55  ;;  %v484_v61 = vpack.c.bf16 %v257_v59, %v255_v58  ;;  %v31_v62 = vld [vmem:[%s778_s1 + $0x50] sm:$0xff]  ;;  %v32_v63 = vld [vmem:[%s778_s1 + $0x58] sm:$0xff]  ;;  %v49_v0 = vld [vmem:[%s778_s1 + $0xe0] sm:$0xff] }
  0x10   :  { %v50_v1 = vld [vmem:[%s778_s1 + $0xe8] sm:$0xff]  ;;  %v453_v3 = vpack.c.bf16 %v32_v63, %v31_v62  ;;  %v254_v4 = vld [vmem:[%s780_s3 + $0x80] sm:$0xff]  ;;  %v256_v5 = vld [vmem:[%s780_s3 + $0x90] sm:$0xff] }
  0x11   :  { %475 = vmatpush1.bf16.xpose.msra.mxu1 %v474_v36  ;;  %v456_v6 = vpack.c.bf16 %v50_v1, %v49_v0  ;;  %v259_v7 = vld [vmem:[%s780_s3 + $0xa8] sm:$0xff]  ;;  %v261_v8 = vld [vmem:[%s780_s3 + $0xb8] sm:$0xff]  ;;  %v486_v9 = vpack.c.bf16 %v256_v5, %v254_v4  ;;  %v33_v11 = vld [vmem:[%s778_s1 + $0x60] sm:$0xff]  ;;  %v55_v36 = vlaneseq }
  0x12   :  { %477 = vmatprep.subr.bf16.mxu1 %v476_v37  ;;  %v488_v10 = vpack.c.bf16 %v261_v8, %v259_v7  ;;  %v34_v12 = vld [vmem:[%s778_s1 + $0x68] sm:$0xff]  ;;  %v51_v13 = vld [vmem:[%s778_s1 + $0xf0] sm:$0xff]  ;;  %v52_v14 = vld [vmem:[%s778_s1 + $0xf8] sm:$0xff] }
  0x13   :  { %v459_v15 = vpack.c.bf16 %v34_v12, %v33_v11  ;;  %v258_v17 = vld [vmem:[%s780_s3 + $0xa0] sm:$0xff]  ;;  %v260_v18 = vld [vmem:[%s780_s3 + $0xb0] sm:$0xff]  ;;  %v462_v19 = vpack.c.bf16 %v52_v14, %v51_v13  ;;  %v263_v20 = vld [vmem:[%s780_s3 + $0xc8] sm:$0xff]  ;;  %v56_v37 = vshrl.u32 %v55_v36, 7 }
  0x14   :  { %v265_v21 = vld [vmem:[%s780_s3 + $0xd8] sm:$0xff]  ;;  %v490_v22 = vpack.c.bf16 %v260_v18, %v258_v17  ;;  %v35_v24 = vld [vmem:[%s778_s1 + $0x70] sm:$0xff]  ;;  %v262_v27 = vld [vmem:[%s780_s3 + $0xc0] sm:$0xff] }
  0x15   :  { %437 = vmatpush3.bf16.xpose.msk.msra.mxu0 %vm538_vm1, %v435_v30  ;;  %v492_v23 = vpack.c.bf16 %v265_v21, %v263_v20  ;;  %v36_v25 = vld [vmem:[%s778_s1 + $0x78] sm:$0xff]  ;;  %v264_v28 = vld [vmem:[%s780_s3 + $0xd0] sm:$0xff]  ;;  %v267_v29 = vld [vmem:[%s780_s3 + $0xe8] sm:$0xff]  ;;  %v57_v2 = vsub.s32 0, %v56_v37  ;;  %v61_v39 = vsub.s32 1, %v56_v37 }
  0x16   :  { %440 = vmatprep.subr.msk.bf16.mxu0 %vm538_vm1, %v438_v33  ;;  %v465_v26 = vpack.c.bf16 %v36_v25, %v35_v24  ;;  %v269_v30 = vld [vmem:[%s780_s3 + $0xf8] sm:$0xff]  ;;  %v494_v31 = vpack.c.bf16 %v264_v28, %v262_v27  ;;  %v266_v33 = vld [vmem:[%s780_s3 + $0xe0] sm:$0xff]  ;;  %v268_v34 = vld [vmem:[%s780_s3 + $0xf0] sm:$0xff] }
  0x17   :  { %v496_v32 = vpack.c.bf16 %v269_v30, %v267_v29  ;;  %v498_v35 = vpack.c.bf16 %v268_v34, %v266_v33  ;;  %v53_v38 = vld [vmem:[%s781_s2] sm:$0x3] }
  0x18   :  { %v58_v40 = vrot.slane %v53_v38, %v57_v2  ;;  %v385_v47 = vld [vmem:[%s782_s4] ss:$0 sm:$0xff] }
  0x19   :  { %479 = vmatpush1.bf16.xpose.msra.mxu1 %v478_v48 }
  0x1a   :  { %481 = vmatprep.subr.bf16.mxu1 %v480_v49 }
  0x1d   :  { %443 = vmatpush3.bf16.xpose.msk.msra.mxu0 %vm538_vm1, %v441_v42 }
  0x1e   :  { %446 = vmatprep.subr.msk.bf16.mxu0 %vm538_vm1, %v444_v45 }
  0x21   :  { %483 = vmatpush1.bf16.xpose.msra.mxu1 %v482_v60 }
  0x22   :  { %485 = vmatprep.subr.bf16.mxu1 %v484_v61 }
  0x25   :  { %449 = vmatpush3.bf16.xpose.msk.msra.mxu0 %vm538_vm1, %v447_v54 }
  0x26   :  { %452 = vmatprep.subr.msk.bf16.mxu0 %vm538_vm1, %v450_v57 }
  0x29   :  { %487 = vmatpush1.bf16.xpose.msra.mxu1 %v486_v9 }
  0x2a   :  { %489 = vmatprep.subr.bf16.mxu1 %v488_v10 }
  0x2d   :  { %455 = vmatpush3.bf16.xpose.msk.msra.mxu0 %vm538_vm1, %v453_v3 }
  0x2e   :  { %458 = vmatprep.subr.msk.bf16.mxu0 %vm538_vm1, %v456_v6 }
  0x31   :  { %491 = vmatpush1.bf16.xpose.msra.mxu1 %v490_v22 }
  0x32   :  { %493 = vmatprep.subr.bf16.mxu1 %v492_v23 }
  0x35   :  { %461 = vmatpush3.bf16.xpose.msk.msra.mxu0 %vm538_vm1, %v459_v15 }
  0x36   :  { %464 = vmatprep.subr.msk.bf16.mxu0 %vm538_vm1, %v462_v19 }
  0x39   :  { %495 = vmatpush1.bf16.xpose.msra.mxu1 %v494_v31 }
  0x3a   :  { %497 = vmatprep.subr.bf16.mxu1 %v496_v32 }
  0x3d   :  { %467 = vmatpush3.bf16.xpose.msk.msra.mxu0 %vm538_vm1, %v465_v26 }
  0x41   :  { %499 = vmatpush1.bf16.xpose.msra.mxu1 %v498_v35 }
  0x44   :  { %419 = vmatmul.mubr.msk.f32.vlgmr.msra.gmra.mrb[0].mxu0 %vm65_vm0, %v575_v16  ;;  %v62_v16 = vrot.slane %v53_v38, %v61_v39 }
 0x117   :  { %v231_v41 = vpop.f32.mrb[0].mxu0 }
 0x118   :  { %v232_v42 = vadd.f32 %v231_v41, %v58_v40  ;;  %v233_v43 = vpop.f32.mrb[1].mxu0 }
 0x119   :  { %v234_v44 = vadd.f32 %v233_v43, %v62_v16 }
 0x11a   :  { %v236_v46 = vmax.f32 %v232_v42, 0.0 }
 0x11b   :  { %v237_v45 = vmax.f32 %v234_v44, 0.0 }
 0x11d   :  { %341 = vmatprep.mubr.f32.mxu1 %v237_v45 }
 0x11e   :  { %342 = vmatmul.mubr.f32.vlgmr.msra.gmra.mrb[0].mxu1 %v236_v46 }
 0x1f1   :  { %v343_v48 = vpop.f32.mrb[0].mxu1 }
 0x1f2   :  { %v344_v49 = vadd.f32 %v385_v47, %v343_v48  ;;  %v345_v50 = vpop.f32.mrb[1].mxu1 }
 0x1f4   :  { %347 = vst [vmem:[%s783_s5] sm:$0xff] %v344_v49 }

</bundles_post_ra>
